<compile_context>
chip_gen: v7x
topology: tpu7x:2x2x1
jax: 0.10.0
libtpu: 0.0.40
codegen_flags: <defaults>
</compile_context>

<pallas_src>
import math
import jax
import jax.numpy as jnp
from jax.experimental import pallas as pl
from jax.experimental.pallas import tpu as pltpu


def _round_up(x, m):
    return ((x + m - 1) // m) * m


def _choose_tile_n(n, max_tile_n=1024):
    """Row-tile size: minimize padding; >=2 tiles for large N (v7x megacore)."""
    num_tiles = pl.cdiv(n, max_tile_n)
    if n >= 512:                        # enough rows to bother splitting
        num_tiles = max(num_tiles, 2)   # give both v7x TensorCores a tile
    tile_n = _round_up(pl.cdiv(n, num_tiles), 8)
    n_pad = _round_up(n, tile_n)
    return tile_n, n_pad


def _vmem_limit_bytes(tile_n, e_total, hidden, k):
    kh = k * hidden
    x_b = tile_n * e_total * 2                      # bf16 activations
    w_b = e_total * kh * 2                          # bf16 block-diag weight
    b_b = kh * 4                                    # f32 bias (pre-scaled by L)
    p_b = kh * kh * 2                               # bf16 permutation
    o_b = tile_n * hidden * 4                       # f32 fused output
    eo_b = 2 * tile_n * kh * 2                      # bf16 emb + attn outputs
    est = 2 * (x_b + w_b + b_b + p_b + o_b + eo_b)  # double buffering
    est = est + est // 2 + (4 << 20)                # margin + compiler scratch
    return int(min(48 << 20, max(16 << 20, est)))   # cap below v7x 64 MiB VMEM


# ----------------------------------------------------------------------------
# Fused K>1 kernel (one pallas_call), per N-tile:
#   y_cat  = x_cat @ W_blockdiag + L*b          (bf16 MXU, f32 acc)  (tile_n,K*H)
#   attn   = softmax_K(tanh(y))                 (f32, EUP reciprocal)
#   fused  = sum_k y_k * attn_k                 (tile_n, H) f32
#   emb/attn re-packed to k-innermost (col = h*K + k) with a constant
#   permutation matmul, stored as bf16 -> (B,S,H,K) is a free reshape outside.
# ----------------------------------------------------------------------------
def _fused_meta_embed(x_cat, w_bd, b_cat, perm, hidden, num_embs,
                      max_tile_n=1024):
    K, H = num_embs, hidden
    N, E_tot = x_cat.shape
    tile_n, n_pad = _choose_tile_n(N, max_tile_n)
    if n_pad != N:
        x_cat = jnp.pad(x_cat, ((0, n_pad - N), (0, 0)))
    grid = (n_pad // tile_n,)

    def kernel(x_ref, w_ref, b_ref, p_ref, out_ref, emb_ref, attn_ref):
        # One block-diagonal projection for all K embeddings (concat layout:
        # columns [k*H, (k+1)*H) hold y_k).
        y = jnp.dot(x_ref[...], w_ref[...],
                    preferred_element_type=jnp.float32) + b_ref[...]

        # attn_sum fusion in f32: tanh -> stable softmax over K -> weighted sum.
        ys = [y[:, k * H:(k + 1) * H] for k in range(K)]
        acts = [jnp.tanh(yk) for yk in ys]
        m = acts[0]
        for k in range(1, K):
            m = jnp.maximum(m, acts[k])
        es = [jnp.exp(a - m) for a in acts]
        s = es[0]
        for k in range(1, K):
            s = s + es[k]
        inv = pl.reciprocal(s, approx=True)      # EUP slot
        attns = [e * inv for e in es]
        fused = ys[0] * attns[0]
        for k in range(1, K):
            fused = fused + ys[k] * attns[k]

        # Re-pack concat layout -> k-innermost layout with the constant 0/1
        # permutation matrix (idle MXU; exact for the bf16 store values).
        emb_int = jnp.dot(y.astype(jnp.bfloat16), p_ref[...],
                          preferred_element_type=jnp.float32)
        attn_int = jnp.dot(attns[0].astype(jnp.bfloat16), p_ref[0:H, :],
                           preferred_element_type=jnp.float32)
        for k in range(1, K):
            attn_int = attn_int + jnp.dot(
                attns[k].astype(jnp.bfloat16), p_ref[k * H:(k + 1) * H, :],
                preferred_element_type=jnp.float32)

        out_ref[...] = fused                            # (tile_n, H)   f32
        emb_ref[...] = emb_int.astype(jnp.bfloat16)     # (tile_n, K*H) bf16
        attn_ref[...] = attn_int.astype(jnp.bfloat16)   # (tile_n, K*H) bf16

    fused, emb, attn = pl.pallas_call(
        kernel,
        grid=grid,
        in_specs=[
            pl.BlockSpec((tile_n, E_tot), lambda i: (i, 0)),
            pl.BlockSpec((E_tot, K * H), lambda i: (0, 0)),
            pl.BlockSpec((1, K * H), lambda i: (0, 0)),
            pl.BlockSpec((K * H, K * H), lambda i: (0, 0)),
        ],
        out_specs=(
            pl.BlockSpec((tile_n, H), lambda i: (i, 0)),
            pl.BlockSpec((tile_n, K * H), lambda i: (i, 0)),
            pl.BlockSpec((tile_n, K * H), lambda i: (i, 0)),
        ),
        out_shape=(
            jax.ShapeDtypeStruct((n_pad, H), jnp.float32),
            jax.ShapeDtypeStruct((n_pad, K * H), jnp.bfloat16),
            jax.ShapeDtypeStruct((n_pad, K * H), jnp.bfloat16),
        ),
        compiler_params=pltpu.CompilerParams(
            dimension_semantics=("parallel",),
            vmem_limit_bytes=_vmem_limit_bytes(tile_n, E_tot, H, K),
        ),
    )(x_cat, w_bd, b_cat, perm)

    if n_pad != N:
        fused, emb, attn = fused[:N], emb[:N], attn[:N]
    return fused, emb, attn


# ----------------------------------------------------------------------------
# K == 1 path: projection-only kernel (no attn output at all).
# ----------------------------------------------------------------------------
def _single_projection(x, w, b_scaled, hidden, max_tile_n=1024):
    N, E = x.shape
    H = hidden
    tile_n, n_pad = _choose_tile_n(N, max_tile_n)
    if n_pad != N:
        x = jnp.pad(x, ((0, n_pad - N), (0, 0)))
    grid = (n_pad // tile_n,)

    def kernel(x_ref, w_ref, b_ref, out_ref):
        out_ref[...] = jnp.dot(x_ref[...], w_ref[...],
                               preferred_element_type=jnp.float32) + b_ref[...]

    out = pl.pallas_call(
        kernel,
        grid=grid,
        in_specs=[
            pl.BlockSpec((tile_n, E), lambda i: (i, 0)),
            pl.BlockSpec((E, H), lambda i: (0, 0)),
            pl.BlockSpec((1, H), lambda i: (0, 0)),
        ],
        out_specs=pl.BlockSpec((tile_n, H), lambda i: (i, 0)),
        out_shape=jax.ShapeDtypeStruct((n_pad, H), jnp.float32),
        compiler_params=pltpu.CompilerParams(
            dimension_semantics=("parallel",),
            vmem_limit_bytes=_vmem_limit_bytes(tile_n, E, H, 1),
        ),
    )(x, w, b_scaled)
    return out[:N] if n_pad != N else out


# ----------------------------------------------------------------------------
# Module wrapper (glue): embedding lookups, L-presum, block-diag weight build.
# ----------------------------------------------------------------------------
def bpe_meta_embedding_forward(input_bpes, emb_tables, enc_weights, enc_biases,
                               bpe_hidden_size):
    """input_bpes: (B, K, S, L) int32; returns (final_embedding, embedding, attn)."""
    B, K, S, L = input_bpes.shape
    H = bpe_hidden_size
    N = B * S
    emb_sizes = [int(t.shape[1]) for t in emb_tables]
    E_tot = sum(emb_sizes)

    # Gather + pre-sum over the bpe-token axis L (linearity:
    # (sum_l x_l) @ W + L*b == sum_l (x_l @ W + b)); concat feature dims so the
    # kernel does one block-diagonal matmul.  XLA fuses take + reduce.
    xs = []
    for k in range(K):
        ids = input_bpes[:, k].reshape(N, L)                  # (N, L)
        g = jnp.take(emb_tables[k], ids, axis=0)              # (N, L, E_k)
        xs.append(jnp.sum(g, axis=1))                         # (N, E_k) f32
    x_cat = jnp.concatenate(xs, axis=-1).astype(jnp.bfloat16)  # (N, E_tot)

    if K == 1:
        b_scaled = (float(L) * enc_biases[0]).reshape(1, H).astype(jnp.float32)
        y = _single_projection(x_cat, enc_weights[0].astype(jnp.bfloat16),
                               b_scaled, H)
        final_embedding = y.reshape(B, S, H)
        return final_embedding, final_embedding, None

    # Block-diagonal weight (concat output layout: column block k holds W_k).
    w_blocks = []
    off = 0
    for k in range(K):
        col = jnp.zeros((E_tot, H), jnp.float32)
        col = jax.lax.dynamic_update_slice(col, enc_weights[k], (off, 0))
        w_blocks.append(col)
        off += emb_sizes[k]
    w_bd = jnp.concatenate(w_blocks, axis=1).astype(jnp.bfloat16)  # (E_tot, K*H)

    # Bias pre-scaled by L (fixes the captured-constant error), concat layout.
    b_cat = (float(L) * jnp.concatenate(enc_biases)).reshape(1, K * H)
    b_cat = b_cat.astype(jnp.float32)

    # Permutation: concat layout (col = k*H + h) -> k-innermost (col = h*K + k).
    src = jnp.arange(K * H)
    dst = (src % H) * K + (src // H)
    perm = jnp.zeros((K * H, K * H), jnp.bfloat16).at[src, dst].set(1)

    fused, emb_pk, attn_pk = _fused_meta_embed(x_cat, w_bd, b_cat, perm, H, K)

    # k-innermost (N, H*K) -> (B, S, H, K) is a free view (no XLA transpose).
    final_embedding = fused.reshape(B, S, H)                  # f32
    embedding = emb_pk.reshape(B, S, H, K)                    # bf16
    attn_scores = attn_pk.reshape(B, S, H, K)                 # bf16
    return final_embedding, embedding, attn_scores


# ----------------------------------------------------------------------------
# Deterministic setup + reference check
# ----------------------------------------------------------------------------
if __name__ == "__main__":
    key = jax.random.PRNGKey(0)

    B, S, L = 2, 8, 4          # batch, max_seq_len, max_bpe_len (uni_emb)
    H = 32                     # bpe_hidden_size
    vocab_sizes = [50, 60]
    emb_sizes = [16, 24]
    K = len(vocab_sizes)

    keys = jax.random.split(key, 4 * K)
    emb_tables, enc_weights, enc_biases, idx_parts = [], [], [], []
    for i in range(K):
        k_tab, k_w, k_b, k_ids = keys[4 * i: 4 * i + 4]
        emb_tables.append(
            jax.random.normal(k_tab, (vocab_sizes[i], emb_sizes[i]), jnp.float32))
        stdv = 1.0 / math.sqrt(emb_sizes[i])
        enc_weights.append(
            jax.random.uniform(k_w, (emb_sizes[i], H), jnp.float32, -stdv, stdv))
        enc_biases.append(
            jax.random.uniform(k_b, (H,), jnp.float32, -stdv, stdv))
        idx_parts.append(
            jax.random.randint(k_ids, (B, S, L), 0, vocab_sizes[i], jnp.int32))

    input_bpes = jnp.stack(idx_parts, axis=1)                 # (B, K, S, L)

    final_emb, embedding, attn_scores = bpe_meta_embedding_forward(
        input_bpes, emb_tables, enc_weights, enc_biases, H)
    jax.block_until_ready((final_emb, embedding, attn_scores))

    # Pure-JAX reference of the same math path (bf16-rounded matmul operands,
    # f32 accumulate; sum over L before the matmul by linearity).
    ref_stack = []
    for i in range(K):
        g = jnp.take(emb_tables[i], input_bpes[:, i], axis=0)   # (B, S, L, E)
        xs_f = jnp.sum(g, axis=2)                               # (B, S, E)
        xs_b = xs_f.astype(jnp.bfloat16).astype(jnp.float32)
        w_b = enc_weights[i].astype(jnp.bfloat16).astype(jnp.float32)
        y = jnp.einsum("bse,eh->bsh", xs_b, w_b,
                       precision=jax.lax.Precision.HIGHEST) + L * enc_biases[i]
        ref_stack.append(y)
    ref_embedding = jnp.stack(ref_stack, axis=-1)               # (B, S, H, K)
    ref_attn = jax.nn.softmax(jnp.tanh(ref_embedding), axis=-1)
    ref_final = jnp.sum(ref_embedding * ref_attn, axis=-1)

    assert final_emb.shape == (B, S, H)
    assert embedding.shape == (B, S, H, K)
    assert attn_scores.shape == (B, S, H, K)
    # emb/attn are bf16 outputs; tolerances cover bf16 rounding + approx recip.
    assert jnp.allclose(embedding.astype(jnp.float32), ref_embedding,
                        atol=3e-2, rtol=2e-2)
    assert jnp.allclose(attn_scores.astype(jnp.float32), ref_attn,
                        atol=2e-2, rtol=2e-2)
    assert jnp.allclose(final_emb, ref_final, atol=5e-2, rtol=5e-2)

    # K == 1 path (projection-only kernel, no attn output).
    f1, e1, a1 = bpe_meta_embedding_forward(
        input_bpes[:, :1], emb_tables[:1], enc_weights[:1], enc_biases[:1], H)
    jax.block_until_ready(f1)
    assert a1 is None and f1.shape == (B, S, H) and e1.shape == (B, S, H)
    assert jnp.allclose(f1, ref_stack[0], atol=5e-3, rtol=5e-3)

    print("KERNEL_OK")
</pallas_src>

<mosaic_0001>
module attributes {stable_mosaic.version = 11 : i64} {
  func.func @kernel(%arg0: i32, %arg1: memref<16x40xbf16, #tpu.memory_space<vmem>>, %arg2: memref<40x64xbf16, #tpu.memory_space<vmem>>, %arg3: memref<1x64xf32, #tpu.memory_space<vmem>>, %arg4: memref<64x64xbf16, #tpu.memory_space<vmem>>, %arg5: memref<16x32xf32, #tpu.memory_space<vmem>>, %arg6: memref<16x64xbf16, #tpu.memory_space<vmem>>, %arg7: memref<16x64xbf16, #tpu.memory_space<vmem>>) attributes {dimension_semantics = [#tpu.dimension_semantics<parallel>], iteration_bounds = array<i64: 1>, scalar_prefetch = 0 : i64, scratch_operands = 0 : i64, tpu.core_type = #tpu.core_type<tc>, window_params = [{transform_indices = @transform_0, window_bounds = array<i64: 16, 40>}, {pipeline_mode = #tpu.pipeline_mode<synchronous>, transform_indices = @transform_1, window_bounds = array<i64: 40, 64>}, {pipeline_mode = #tpu.pipeline_mode<synchronous>, transform_indices = @transform_2, window_bounds = array<i64: 1, 64>}, {pipeline_mode = #tpu.pipeline_mode<synchronous>, transform_indices = @transform_3, window_bounds = array<i64: 64, 64>}, {transform_indices = @transform_4, window_bounds = array<i64: 16, 32>}, {transform_indices = @transform_5, window_bounds = array<i64: 16, 64>}, {transform_indices = @transform_6, window_bounds = array<i64: 16, 64>}]} {
    %c0 = arith.constant 0 : index
    %c0_0 = arith.constant 0 : index
    %0 = vector.load %arg1[%c0, %c0_0] : memref<16x40xbf16, #tpu.memory_space<vmem>>, vector<16x40xbf16>
    %c0_1 = arith.constant 0 : index
    %c0_2 = arith.constant 0 : index
    %1 = vector.load %arg2[%c0_1, %c0_2] : memref<40x64xbf16, #tpu.memory_space<vmem>>, vector<40x64xbf16>
    %cst = arith.constant dense<0.000000e+00> : vector<16x64xf32>
    %2 = tpu.matmul %0, %1, %cst {dimension_numbers = #tpu.dot_dimension_numbers<[1], [0], [0], [1], [0, 0, 1, 1], [], []>} : vector<16x40xbf16>, vector<40x64xbf16>, vector<16x64xf32> -> vector<16x64xf32>
    %c0_3 = arith.constant 0 : index
    %c0_4 = arith.constant 0 : index
    %3 = vector.load %arg3[%c0_3, %c0_4] : memref<1x64xf32, #tpu.memory_space<vmem>>, vector<1x64xf32>
    %4 = vector.broadcast %3 : vector<1x64xf32> to vector<16x64xf32>
    %5 = arith.addf %2, %4 : vector<16x64xf32>
    %6 = vector.extract_strided_slice %5 {offsets = [0, 0], sizes = [16, 32], strides = [1, 1]} : vector<16x64xf32> to vector<16x32xf32>
    %7 = vector.extract_strided_slice %5 {offsets = [0, 32], sizes = [16, 32], strides = [1, 1]} : vector<16x64xf32> to vector<16x32xf32>
    %8 = math.tanh %6 : vector<16x32xf32>
    %9 = math.tanh %7 : vector<16x32xf32>
    %10 = arith.maximumf %8, %9 : vector<16x32xf32>
    %11 = arith.subf %8, %10 : vector<16x32xf32>
    %12 = math.exp %11 : vector<16x32xf32>
    %13 = arith.subf %9, %10 : vector<16x32xf32>
    %14 = math.exp %13 : vector<16x32xf32>
    %15 = arith.addf %12, %14 : vector<16x32xf32>
    %16 = tpu.reciprocal %15 {approx = true} : vector<16x32xf32> -> vector<16x32xf32>
    %17 = arith.mulf %12, %16 : vector<16x32xf32>
    %18 = arith.mulf %14, %16 : vector<16x32xf32>
    %19 = arith.mulf %6, %17 : vector<16x32xf32>
    %20 = arith.mulf %7, %18 : vector<16x32xf32>
    %21 = arith.addf %19, %20 : vector<16x32xf32>
    %22 = arith.truncf %5 : vector<16x64xf32> to vector<16x64xbf16>
    %c0_5 = arith.constant 0 : index
    %c0_6 = arith.constant 0 : index
    %23 = vector.load %arg4[%c0_5, %c0_6] : memref<64x64xbf16, #tpu.memory_space<vmem>>, vector<64x64xbf16>
    %cst_7 = arith.constant dense<0.000000e+00> : vector<16x64xf32>
    %24 = tpu.matmul %22, %23, %cst_7 {dimension_numbers = #tpu.dot_dimension_numbers<[1], [0], [0], [1], [0, 0, 1, 1], [], []>} : vector<16x64xbf16>, vector<64x64xbf16>, vector<16x64xf32> -> vector<16x64xf32>
    %25 = arith.truncf %17 : vector<16x32xf32> to vector<16x32xbf16>
    %c0_8 = arith.constant 0 : index
    %c0_9 = arith.constant 0 : index
    %26 = vector.load %arg4[%c0_8, %c0_9] : memref<64x64xbf16, #tpu.memory_space<vmem>>, vector<32x64xbf16>
    %cst_10 = arith.constant dense<0.000000e+00> : vector<16x64xf32>
    %27 = tpu.matmul %25, %26, %cst_10 {dimension_numbers = #tpu.dot_dimension_numbers<[1], [0], [0], [1], [0, 0, 1, 1], [], []>} : vector<16x32xbf16>, vector<32x64xbf16>, vector<16x64xf32> -> vector<16x64xf32>
    %28 = arith.truncf %18 : vector<16x32xf32> to vector<16x32xbf16>
    %c32 = arith.constant 32 : index
    %c0_11 = arith.constant 0 : index
    %29 = vector.load %arg4[%c32, %c0_11] : memref<64x64xbf16, #tpu.memory_space<vmem>>, vector<32x64xbf16>
    %cst_12 = arith.constant dense<0.000000e+00> : vector<16x64xf32>
    %30 = tpu.matmul %28, %29, %cst_12 {dimension_numbers = #tpu.dot_dimension_numbers<[1], [0], [0], [1], [0, 0, 1, 1], [], []>} : vector<16x32xbf16>, vector<32x64xbf16>, vector<16x64xf32> -> vector<16x64xf32>
    %31 = arith.addf %27, %30 : vector<16x64xf32>
    %c0_13 = arith.constant 0 : index
    %c0_14 = arith.constant 0 : index
    %32 = vector.load %arg5[%c0_13, %c0_14] : memref<16x32xf32, #tpu.memory_space<vmem>>, vector<16x32xf32>
    tpu.vector_store %arg5[%c0_13, %c0_14], %21 {strides = array<i32>} : memref<16x32xf32, #tpu.memory_space<vmem>>, vector<16x32xf32>,
    %33 = arith.truncf %24 : vector<16x64xf32> to vector<16x64xbf16>
    %c0_15 = arith.constant 0 : index
    %c0_16 = arith.constant 0 : index
    %34 = vector.load %arg6[%c0_15, %c0_16] : memref<16x64xbf16, #tpu.memory_space<vmem>>, vector<16x64xbf16>
    tpu.vector_store %arg6[%c0_15, %c0_16], %33 {strides = array<i32>} : memref<16x64xbf16, #tpu.memory_space<vmem>>, vector<16x64xbf16>,
    %35 = arith.truncf %31 : vector<16x64xf32> to vector<16x64xbf16>
    %c0_17 = arith.constant 0 : index
    %c0_18 = arith.constant 0 : index
    %36 = vector.load %arg7[%c0_17, %c0_18] : memref<16x64xbf16, #tpu.memory_space<vmem>>, vector<16x64xbf16>
    tpu.vector_store %arg7[%c0_17, %c0_18], %35 {strides = array<i32>} : memref<16x64xbf16, #tpu.memory_space<vmem>>, vector<16x64xbf16>,
    return
  }
  func.func @transform_0(%arg0: i32) -> (i32, i32) {
    %c0_i32 = arith.constant 0 : i32
    %c0_i32_0 = arith.constant 0 : i32
    return %arg0, %c0_i32 : i32, i32
  }
  func.func @transform_1(%arg0: i32) -> (i32, i32) {
    %c0_i32 = arith.constant 0 : i32
    %c0_i32_0 = arith.constant 0 : i32
    %c0_i32_1 = arith.constant 0 : i32
    return %c0_i32, %c0_i32_0 : i32, i32
  }
  func.func @transform_2(%arg0: i32) -> (i32, i32) {
    %c0_i32 = arith.constant 0 : i32
    %c0_i32_0 = arith.constant 0 : i32
    %c0_i32_1 = arith.constant 0 : i32
    return %c0_i32, %c0_i32_0 : i32, i32
  }
  func.func @transform_3(%arg0: i32) -> (i32, i32) {
    %c0_i32 = arith.constant 0 : i32
    %c0_i32_0 = arith.constant 0 : i32
    %c0_i32_1 = arith.constant 0 : i32
    return %c0_i32, %c0_i32_0 : i32, i32
  }
  func.func @transform_4(%arg0: i32) -> (i32, i32) {
    %c0_i32 = arith.constant 0 : i32
    %c0_i32_0 = arith.constant 0 : i32
    return %arg0, %c0_i32 : i32, i32
  }
  func.func @transform_5(%arg0: i32) -> (i32, i32) {
    %c0_i32 = arith.constant 0 : i32
    %c0_i32_0 = arith.constant 0 : i32
    return %arg0, %c0_i32 : i32, i32
  }
  func.func @transform_6(%arg0: i32) -> (i32, i32) {
    %c0_i32 = arith.constant 0 : i32
    %c0_i32_0 = arith.constant 0 : i32
    return %arg0, %c0_i32 : i32, i32
  }
}

</mosaic_0001>

<bundles_post_ra>
// kernel: tpu_custom_call.1
= control target key start
LH: loop header
LB: loop body
LE: loop exit
PB: predicated region body
PF: predicated region fallthrough
CT: control target
= control target key end

     0   :  { %12 = vsyncpa [#allocation3], 0  ;;  %s931_s0 = inlined_call_operand.hbm [shape: bf16[16,40], index: 0, kind: input, shape index: {}]   ;;  %s932_s1 = inlined_call_operand.hbm [shape: bf16[40,64], index: 1, kind: input, shape index: {}]   ;;  %s933_s2 = inlined_call_operand.vmem [shape: f32[1,64], index: 2, kind: input, shape index: {}]   ;;  %s934_s3 = inlined_call_operand.hbm [shape: bf16[64,64], index: 3, kind: input, shape index: {}]   ;;  %s935_s4 = inlined_call_operand.hbm [shape: f32[16,32], index: 4, kind: output, shape index: {0}]   ;;  %s936_s5 = inlined_call_operand.hbm [shape: bf16[16,64], index: 5, kind: output, shape index: {1}]   ;;  %s937_s6 = inlined_call_operand.hbm [shape: bf16[16,64], index: 6, kind: output, shape index: {2}]  }
   0x1   :  { %13 = vsyncpa [#allocation6], 0 }
   0x2   :  { %14 = vsyncpa [#allocation4], 0 }
   0x3   :  { %15 = vsyncpa [#allocation10], 0  ;;  %s735_s21 = smov [#allocation5]   ;;  %s736_s23 = smov [#allocation2]  }
   0x4   :  { %s33_s22 = sshll.u32 %s735_s21, 4  ;;  %s21_s24 = sshll.u32 %s736_s23, 4  ;;  %s34_s22 = int_to_ptr.vmem [resolvable:$true] %s33_s22  ;;  %s784_s24 = int_to_ptr.vmem [resolvable:$true] %s21_s24 }
   0x5   :  { %s595_s27 = scalar_lea.hbm %s932_s1, 320 }
   0x6   :  { %p596_p0 = scmp.ne.s32.totalorder %s932_s1, %s595_s27  ;;  %p599_p1 = scmp.lt.u32.totalorder %s595_s27, %s932_s1 }
   0x8   :  { %p601_p2 = pnand %p599_p1, %p596_p0 }
   0xa   :  { %604 = shalt.err (!%p601_p2)
}
   0xb   :  { %s605_s8 = scalar_lea.vmem %s34_s22, 320  ;;  %p610_p4 = scmp.lt.s32.totalorder %s34_s22, %s34_s22 }
   0xc   :  { %p606_p3 = scmp.ne.s32.totalorder %s34_s22, %s605_s8  ;;  %p611_p5 = scmp.lt.s32.totalorder %s605_s8, %s605_s8 }
   0xe   :  { %p612_p6 = por %p611_p5, %p610_p4 }
  0x10   :  { %p613_p7 = pnand %p612_p6, %p606_p3 }
  0x12   :  { %616 = shalt.err (!%p613_p7)
}
  0x13   :  { %s737_s9 = smov 64   ;;  %s738_s10 = smov 4  }
  0x14   :  { %39 = dma.hbm_to_vmem [thread:$0]  %s932_s1, 320, %s34_s22, [#allocation6], %s737_s9, %s737_s9, %s738_s10  }
  0x15   :  { %s617_s15 = scalar_lea.hbm %s931_s0, 128 }
  0x16   :  { %p618_p8 = scmp.ne.s32.totalorder %s931_s0, %s617_s15  ;;  %p621_p9 = scmp.lt.u32.totalorder %s617_s15, %s931_s0 }
  0x18   :  { %p623_p10 = pnand %p621_p9, %p618_p8 }
  0x1a   :  { %626 = shalt.err (!%p623_p10)
}
  0x1b   :  { %s627_s20 = scalar_lea.vmem %s784_s24, 128  ;;  %p632_p12 = scmp.lt.s32.totalorder %s784_s24, %s784_s24 }
  0x1c   :  { %p628_p11 = scmp.ne.s32.totalorder %s784_s24, %s627_s20  ;;  %p633_p13 = scmp.lt.s32.totalorder %s627_s20, %s627_s20 }
  0x1e   :  { %p634_p0 = por %p633_p13, %p632_p12 }
  0x20   :  { %p635_p1 = pnand %p634_p0, %p628_p11 }
  0x22   :  { %638 = shalt.err (!%p635_p1)
}
  0x23   :  { %27 = dma.hbm_to_vmem [thread:$0]  %s931_s0, 128, %s784_s24, [#allocation3], %s737_s9, %s737_s9, %s738_s10  }
  0x24   :  { %s739_s22 = smov [#allocation7]   ;;  %s639_s27 = scalar_lea.hbm %s934_s3, 512 }
  0x25   :  { %s47_s23 = sshll.u32 %s739_s22, 4  ;;  %p640_p2 = scmp.ne.s32.totalorder %s934_s3, %s639_s27  ;;  %s48_s23 = int_to_ptr.vmem [resolvable:$true] %s47_s23 }
  0x26   :  { %p643_p3 = scmp.lt.u32.totalorder %s639_s27, %s934_s3 }
  0x28   :  { %p645_p4 = pnand %p643_p3, %p640_p2 }
  0x2a   :  { %648 = shalt.err (!%p645_p4)
}
  0x2b   :  { %s649_s8 = scalar_lea.vmem %s48_s23, 512  ;;  %p654_p6 = scmp.lt.s32.totalorder %s48_s23, %s48_s23 }
  0x2c   :  { %p650_p5 = scmp.ne.s32.totalorder %s48_s23, %s649_s8  ;;  %p655_p7 = scmp.lt.s32.totalorder %s649_s8, %s649_s8 }
  0x2e   :  { %p656_p8 = por %p655_p7, %p654_p6 }
  0x30   :  { %p657_p9 = pnand %p656_p8, %p650_p5 }
  0x32   :  { %660 = shalt.err (!%p657_p9)
}
  0x33   :  { %53 = dma.hbm_to_vmem [thread:$0]  %s934_s3, 512, %s48_s23, [#allocation6], %s737_s9, %s737_s9, %s738_s10  }
  0x34   :  { %727 = dma.done.wait [#allocation3], 128  }
  0x35   :  { %728 = vsyncadd [#allocation3], 4294967168 }
  0x36   :  { %729 = dma.done.wait [#allocation6], 832  }
  0x37   :  { %730 = vsyncadd [#allocation6], 4294966464  ;;  %v740_v0 = vmov 0.0   ;;  %vm741_vm0 = vmmov 0   ;;  %v569_v1 = vld [vmem:[#allocation5] sm:$0xff]   ;;  %v570_v2 = vld [vmem:[#allocation5 + $0x8] sm:$0xff]  }
  0x38   :  { %515 = vmatprep.subr.bf16.mxu0 %v740_v0  ;;  %521 = vmatprep.mubr.msk.bf16.mxu0 %vm741_vm0, %v740_v0  ;;  %vm102_vm1 = vcmask 1043456   ;;  %v571_v3 = vld [vmem:[#allocation5 + $0x10] ss:$0 sps:$4 sm:$0xff]   ;;  %v573_v4 = vld [vmem:[#allocation7] sm:$0xff]   ;;  %v574_v6 = vld [vmem:[#allocation7 + $0x8] sm:$0xff]   ;;  %vm98_vm2 = vcmask 326656  }
  0x39   :  { %525 = vmatprep.subr.bf16.mxu1 %v740_v0  ;;  %533 = vmatprep.mubr.msk.bf16.mxu1 %vm741_vm0, %v740_v0  ;;  %v104_v5 = vsel %vm102_vm1, %v571_v3, 0  ;;  %v572_v7 = vld [vmem:[#allocation2] sm:$0xff]   ;;  %v575_v8 = vld [vmem:[#allocation7 + $0x10] sm:$0xff]   ;;  %v576_v9 = vld [vmem:[#allocation7 + $0x18] sm:$0xff]   ;;  %vm250_vm3 = vcmask 523264   ;;  %s743_s12 = smov 32  }
  0x3a   :  { %516 = vmatpush3.bf16.msra.mxu0 %v569_v1  ;;  %526 = vmatpush3.bf16.msra.mxu1 %v573_v4  ;;  %v477_v10 = vld [vmem:[%s933_s2] ss:$0 sm:$0xff]  ;;  %s742_s2 = smov 96   ;;  %vm415_vm4 = vcmask 519168   ;;  %v578_v39 = vld [vmem:[#allocation7 + $0x8] sm:$0xff]   ;;  %vm304_vm5 = vcmask 261120  }
  0x3b   :  { %517 = vmatprep.subr.bf16.mxu0 %v740_v0  ;;  %527 = vmatprep.subr.bf16.mxu1 %v740_v0  ;;  %v577_v37 = vld [vmem:[#allocation7] sm:$0xff]   ;;  %s744_s13 = smov [#allocation9]   ;;  %s745_s15 = smov [#allocation8]  }
  0x3c   :  { %s445_s14 = sshll.u32 %s744_s13, 4  ;;  %s433_s16 = sshll.u32 %s745_s15, 4  ;;  %s446_s14 = int_to_ptr.vmem [resolvable:$true] %s445_s14  ;;  %s434_s16 = int_to_ptr.vmem [resolvable:$true] %s433_s16 }
  0x3d   :  { %s661_s17 = scalar_lea.vmem %s446_s14, 128  ;;  %p666_p11 = scmp.lt.s32.totalorder %s446_s14, %s446_s14 }
  0x3e   :  { %518 = vmatpush3.bf16.msra.mxu0 %v570_v2  ;;  %528 = vmatpush3.bf16.msra.mxu1 %v574_v6  ;;  %p662_p10 = scmp.ne.s32.totalorder %s446_s14, %s661_s17  ;;  %p667_p12 = scmp.lt.s32.totalorder %s661_s17, %s661_s17 }
  0x3f   :  { %519 = vmatprep.subr.bf16.mxu0 %v740_v0  ;;  %529 = vmatprep.subr.bf16.mxu1 %v740_v0 }
  0x40   :  { %p668_p13 = por %p667_p12, %p666_p11 }
  0x42   :  { %520 = vmatpush3.bf16.msra.mxu0 %v104_v5  ;;  %530 = vmatpush3.bf16.msra.mxu1 %v575_v8  ;;  %p669_p0 = pnand %p668_p13, %p662_p10 }
  0x43   :  { %545 = vmatprep.subr.bf16.mxu0 %v740_v0  ;;  %531 = vmatprep.subr.bf16.mxu1 %v740_v0 }
  0x45   :  { %522 = vmatmul.mubr.msk.bf16.vlgmr.msra.gmra.mrb[0].mxu0 %vm98_vm2, %v572_v7 }
  0x46   :  { %549 = vmatprep.mubr.msk.bf16.mxu0 %vm741_vm0, %v740_v0  ;;  %532 = vmatpush3.bf16.msra.mxu1 %v576_v9 }
  0x47   :  { %537 = vmatprep.subr.bf16.mxu1 %v740_v0  ;;  %546 = vmatpush3.bf16.msra.mxu0 %v577_v37 }
  0x48   :  { %547 = vmatprep.subr.bf16.mxu0 %v740_v0 }
  0x4b   :  { %548 = vmatpush3.bf16.msra.mxu0 %v578_v39 }
 0x118   :  { %v140_v11 = vpop.f32.mrb[0].mxu0 }
 0x119   :  { %v854_v12 = vadd.f32 %v477_v10, %v140_v11  ;;  %v523_v13 = vpop.f32.mrb[1].mxu0 }
 0x11a   :  { %v143_v14 = vpop.f32.mrb[2].mxu0 }
 0x11b   :  { %579 = vtanh.f32 %v854_v12  ;;  %v857_v15 = vadd.f32 %v477_v10, %v143_v14  ;;  %v524_v16 = vpop.f32.mrb[3].mxu0 }
 0x11d   :  { %v217_v17 = vpack.c.bf16 %v857_v15, %v854_v12  ;;  %581 = vtanh.f32 %v857_v15 }
 0x11f   :  { %534 = vmatmul.mubr.msk.bf16.vlgmr.msra.gmra.mrb[0].mxu1 %vm250_vm3, %v217_v17 }
 0x120   :  { %538 = vmatpush3.bf16.msra.mxu1 %v575_v8  ;;  %541 = vmatprep.mubr.msk.bf16.mxu1 %vm741_vm0, %v740_v0 }
 0x121   :  { %539 = vmatprep.subr.bf16.mxu1 %v740_v0 }
 0x124   :  { %540 = vmatpush3.bf16.msra.mxu1 %v576_v9 }
 0x125   :  { %v580_v18 = vpop.eup %579 }
 0x126   :  { %151 = vrot.lane.b32.xlu0 %v580_v18, %s742_s2 }
 0x127   :  { %v582_v19 = vpop.eup %581 }
 0x12a   :  { %153 = vrot.lane.b32.xlu0 %v582_v19, %s742_s2 }
 0x198   :  { %v152_v20 = vpop.permute.xlu0 %151 }
 0x199   :  { %v157_v21 = vmax.f32 %v580_v18, %v152_v20 }
 0x19b   :  { %167 = vrot.lane.b32.xlu1 %v157_v21, %s743_s12  ;;  %v159_v40 = vsub.f32 %v580_v18, %v157_v21 }
 0x19c   :  { %v154_v22 = vpop.permute.xlu0 %153 }
 0x19d   :  { %v158_v23 = vmax.f32 %v582_v19, %v154_v22  ;;  %v161_v41 = vmul.f32 1.442695, %v159_v40 }
 0x19f   :  { %169 = vrot.lane.b32.xlu1 %v158_v23, %s743_s12  ;;  %v160_v42 = vsub.f32 %v582_v19, %v158_v23 }
 0x1a1   :  { %v163_v43 = vmul.f32 1.442695, %v160_v42 }
 0x1f2   :  { %v288_v24 = vpop.f32.mrb[0].mxu1 }
 0x1f3   :  { %v496_v25 = vpack.c.bf16 %v288_v24, %v288_v24  ;;  %v535_v26 = vpop.f32.mrb[1].mxu1 }
 0x1f4   :  { %v291_v27 = vpop.f32.mrb[2].mxu1 }
 0x1f5   :  { %v497_v28 = vpack.c.bf16 %v291_v27, %v291_v27  ;;  %v536_v29 = vpop.f32.mrb[3].mxu1  ;;  %416 = vst.msk [vmem:[#allocation9] sm:$0xf] %vm415_vm4, %v496_v25 }
 0x1f7   :  { %417 = vst.msk [vmem:[#allocation9 + $0x4] sm:$0xf] %vm415_vm4, %v497_v28 }
 0x20d   :  { %v168_v30 = vpop.permute.xlu1 %167 }
 0x20e   :  { %v173_v31 = vsub.f32 %v580_v18, %v168_v30 }
 0x210   :  { %v175_v32 = vmul.f32 1.442695, %v173_v31 }
 0x211   :  { %v170_v33 = vpop.permute.xlu1 %169 }
 0x212   :  { %583 = vpow2.f32 %v175_v32  ;;  %v174_v34 = vsub.f32 %v582_v19, %v170_v33 }
 0x214   :  { %v177_v35 = vmul.f32 1.442695, %v174_v34 }
 0x216   :  { %585 = vpow2.f32 %v177_v35 }
 0x217   :  { %587 = vpow2.f32 %v161_v41 }
 0x218   :  { %589 = vpow2.f32 %v163_v43 }
 0x21c   :  { %v584_v36 = vpop.eup %583 }
 0x21d   :  { %181 = vrot.lane.b32.xlu0 %v584_v36, %s742_s2 }
 0x220   :  { %v586_v38 = vpop.eup %585 }
 0x221   :  { %183 = vrot.lane.b32.xlu1 %v586_v38, %s742_s2  ;;  %v588_v44 = vpop.eup %587 }
 0x222   :  { %v590_v47 = vpop.eup %589 }
 0x28f   :  { %v182_v45 = vpop.permute.xlu0 %181 }
 0x290   :  { %v187_v46 = vadd.f32 %v588_v44, %v182_v45 }
 0x292   :  { %591 = vrcp.f32 %v187_v46 }
 0x293   :  { %v184_v48 = vpop.permute.xlu1 %183 }
 0x294   :  { %v188_v49 = vadd.f32 %v590_v47, %v184_v48 }
 0x296   :  { %593 = vrcp.f32 %v188_v49 }
 0x29c   :  { %v592_v50 = vpop.eup %591 }
 0x29d   :  { %195 = vrot.lane.b32.xlu0 %v592_v50, %s743_s12  ;;  %v191_v52 = vmul.f32 %v592_v50, %v588_v44 }
 0x29f   :  { %v203_v2 = vmul.f32 %v191_v52, %v854_v12 }
 0x2a0   :  { %v594_v51 = vpop.eup %593 }
 0x2a1   :  { %v192_v53 = vmul.f32 %v594_v51, %v590_v47  ;;  %197 = vrot.lane.b32.xlu1 %v594_v51, %s743_s12 }
 0x2a3   :  { %v295_v54 = vpack.c.bf16 %v192_v53, %v191_v52  ;;  %v204_v6 = vmul.f32 %v192_v53, %v857_v15 }
 0x2a5   :  { %550 = vmatmul.mubr.msk.bf16.vlgmr.msra.gmra.mrb[4].mxu0 %vm304_vm5, %v295_v54 }
 0x30f   :  { %v196_v55 = vpop.permute.xlu0 %195 }
 0x310   :  { %v201_v56 = vmul.f32 %v584_v36, %v196_v55 }
 0x312   :  { %v205_v57 = vmul.f32 %v201_v56, %v854_v12 }
 0x313   :  { %v198_v58 = vpop.permute.xlu1 %197 }
 0x314   :  { %v202_v59 = vmul.f32 %v586_v38, %v198_v58  ;;  %209 = vrot.lane.b32.xlu1 %v205_v57, %s742_s2 }
 0x316   :  { %v300_v60 = vpack.c.bf16 %v202_v59, %v201_v56  ;;  %v206_v61 = vmul.f32 %v202_v59, %v857_v15 }
 0x318   :  { %302 = vrot.lane.b32.xlu0 %v300_v60, %s742_s2 }
 0x31c   :  { %211 = vrot.lane.b32.xlu0 %v206_v61, %s742_s2 }
 0x378   :  { %v398_v62 = vpop.f32.mrb[4].mxu0 }
 0x379   :  { %v551_v63 = vpop.f32.mrb[5].mxu0 }
 0x37a   :  { %v401_v0 = vpop.f32.mrb[6].mxu0 }
 0x37b   :  { %v552_v1 = vpop.f32.mrb[7].mxu0 }
 0x386   :  { %v210_v3 = vpop.permute.xlu1 %209 }
 0x387   :  { %v215_v4 = vadd.f32 %v210_v3, %v203_v2 }
 0x389   :  { %405 = vst.msk [vmem:[#allocation8] sm:$0xff] %vm304_vm5, %v215_v4 }
 0x38a   :  { %v303_v5 = vpop.permute.xlu0 %302 }
 0x38b   :  { %542 = vmatmul.mubr.msk.bf16.vlgmr.msra.gmra.mrb[4].mxu1 %vm304_vm5, %v303_v5 }
 0x38e   :  { %v212_v7 = vpop.permute.xlu0 %211 }
 0x38f   :  { %v216_v8 = vadd.f32 %v212_v7, %v204_v6 }
 0x391   :  { %406 = vst.msk [vmem:[#allocation8 + $0x8] sm:$0xff] %vm304_vm5, %v216_v8 }
 0x392   :  { %672 = shalt.err (!%p669_p0)
}
 0x393   :  { %s673_s20 = scalar_lea.hbm %s936_s5, 128 }
 0x394   :  { %p674_p1 = scmp.ne.s32.totalorder %s936_s5, %s673_s20  ;;  %p677_p2 = scmp.lt.u32.totalorder %s673_s20, %s936_s5 }
 0x396   :  { %p679_p3 = pnand %p677_p2, %p674_p1 }
 0x398   :  { %682 = shalt.err (!%p679_p3)
}
 0x399   :  { %451 = dma.vmem_to_hbm [thread:$0]  %s446_s14, 128, %s936_s5, [#allocation10], %s737_s9, %s737_s9, %s738_s10  }
 0x39a   :  { %s683_s27 = scalar_lea.vmem %s434_s16, 256  ;;  %p688_p5 = scmp.lt.s32.totalorder %s434_s16, %s434_s16 }
 0x39b   :  { %p684_p4 = scmp.ne.s32.totalorder %s434_s16, %s683_s27  ;;  %p689_p6 = scmp.lt.s32.totalorder %s683_s27, %s683_s27 }
 0x39d   :  { %p690_p7 = por %p689_p6, %p688_p5 }
 0x39f   :  { %p691_p8 = pnand %p690_p7, %p684_p4 }
 0x3a1   :  { %694 = shalt.err (!%p691_p8)
}
 0x3a2   :  { %s695_s30 = scalar_lea.hbm %s935_s4, 256 }
 0x3a3   :  { %p696_p9 = scmp.ne.s32.totalorder %s935_s4, %s695_s30  ;;  %p699_p10 = scmp.lt.u32.totalorder %s695_s30, %s935_s4 }
 0x3a5   :  { %p701_p11 = pnand %p699_p10, %p696_p9 }
 0x3a7   :  { %704 = shalt.err (!%p701_p11)
}
 0x3a8   :  { %s746_s5 = smov 128   ;;  %s747_s3 = smov 8  }
 0x3a9   :  { %439 = dma.vmem_to_hbm [thread:$0]  %s434_s16, 256, %s935_s4, [#allocation4], %s746_s5, %s746_s5, %s747_s3  }
 0x3aa   :  { %s748_s12 = smov [#allocation11]  }
 0x3ab   :  { %s457_s13 = sshll.u32 %s748_s12, 4  ;;  %s458_s13 = int_to_ptr.vmem [resolvable:$true] %s457_s13 }
 0x3ac   :  { %s705_s14 = scalar_lea.vmem %s458_s13, 128  ;;  %p710_p13 = scmp.lt.s32.totalorder %s458_s13, %s458_s13 }
 0x3ad   :  { %p706_p12 = scmp.ne.s32.totalorder %s458_s13, %s705_s14  ;;  %p711_p0 = scmp.lt.s32.totalorder %s705_s14, %s705_s14 }
 0x3af   :  { %p712_p1 = por %p711_p0, %p710_p13 }
 0x3b1   :  { %p713_p2 = pnand %p712_p1, %p706_p12 }
 0x45e   :  { %v342_v9 = vpop.f32.mrb[4].mxu1 }
 0x45f   :  { %v399_v10 = vadd.f32 %v398_v62, %v342_v9  ;;  %v543_v11 = vpop.f32.mrb[5].mxu1 }
 0x460   :  { %v345_v12 = vpop.f32.mrb[6].mxu1 }
 0x461   :  { %v498_v13 = vpack.c.bf16 %v399_v10, %v399_v10  ;;  %v402_v14 = vadd.f32 %v401_v0, %v345_v12  ;;  %v544_v15 = vpop.f32.mrb[7].mxu1 }
 0x463   :  { %426 = vst.msk [vmem:[#allocation11] sm:$0xf] %vm415_vm4, %v498_v13  ;;  %v499_v16 = vpack.c.bf16 %v402_v14, %v402_v14 }
 0x465   :  { %427 = vst.msk [vmem:[#allocation11 + $0x4] sm:$0xf] %vm415_vm4, %v499_v16 }
 0x466   :  { %716 = shalt.err (!%p713_p2)
}
 0x467   :  { %s717_s16 = scalar_lea.hbm %s937_s6, 128 }
 0x468   :  { %p718_p3 = scmp.ne.s32.totalorder %s937_s6, %s717_s16  ;;  %p721_p4 = scmp.lt.u32.totalorder %s717_s16, %s937_s6 }
 0x46a   :  { %p723_p5 = pnand %p721_p4, %p718_p3 }
 0x46c   :  { %726 = shalt.err (!%p723_p5)
}
 0x46d   :  { %463 = dma.vmem_to_hbm [thread:$0]  %s458_s13, 128, %s937_s6, [#allocation10], %s737_s9, %s737_s9, %s738_s10  }
 0x46e   :  { %731 = dma.done.wait [#allocation4], 256  }
 0x46f   :  { %732 = vsyncadd [#allocation4], 4294967040 }
 0x470   :  { %733 = dma.done.wait [#allocation10], 256  }
 0x471   :  { %734 = vsyncadd [#allocation10], 4294967040 }
 0x472   :  { %473 = vsyncpa [#allocation3], 1 }
 0x473   :  { %474 = vsyncpa [#allocation6], 1 }
 0x474   :  { %475 = vsyncpa [#allocation4], 1 }
 0x475   :  { %476 = vsyncpa [#allocation10], 1 }

</bundles_post_ra>
